<compile_context>
chip_gen: v6e
topology: v6e:2x2x1
jax: 0.10.0
libtpu: 0.0.40
codegen_flags: <defaults>
</compile_context>

<pallas_src>
import jax
import jax.numpy as jnp
from jax import lax
from jax.experimental import pallas as pl
from jax.experimental.pallas import tpu as pltpu


# ---------------------------------------------------------------------------
# Pallas kernel
# ---------------------------------------------------------------------------
def _make_kernel(Nb, H, W, C2, Cout):
    M = Nb * H
    K1 = 3 * W * C2          # conv1 contraction (kh-stacked, W-pad folded)
    WCo = W * Cout           # conv output row width
    K2 = 3 * WCo             # conv2 contraction
    NU = 4 * WCo             # upsample output row width (di, 2w+dj, co)

    def kernel(x_ref, w1_ref, t1_ref, w2_ref, b2_ref, wu_ref, bu_ref, out_ref):
        # ---- Conv2d #1 (3x3) + folded bias/BN1 + ReLU: ONE matmul ----------
        xcat = x_ref[...].reshape(M, K1)                        # bf16
        acc1 = jnp.dot(xcat, w1_ref[...],
                       preferred_element_type=jnp.float32)      # (M, WCo) f32
        y = jnp.maximum(acc1 + t1_ref[...], 0.0).astype(jnp.bfloat16)

        # ---- Conv2d #2 (3x3) + bias + ReLU: in-register kh im2row ----------
        # Per-image vertical zero rows (no scratch slab, no border zeroing).
        y3 = y.reshape(Nb, H, WCo)
        zrow = jnp.zeros((Nb, 1, WCo), jnp.bfloat16)
        yp = jnp.concatenate([zrow, y3, zrow], axis=1)          # (Nb, H+2, WCo)
        ycat = jnp.concatenate([yp[:, kh:kh + H, :] for kh in range(3)],
                               axis=-1).reshape(M, K2)
        acc2 = jnp.dot(ycat, w2_ref[...],
                       preferred_element_type=jnp.float32)
        y2 = jnp.maximum(acc2 + b2_ref[...], 0.0).astype(jnp.bfloat16)

        # ---- BN2 (folded into wu/bu) + ConvTranspose2d(2,2) + ReLU ----------
        o = jnp.dot(y2, wu_ref[...], preferred_element_type=jnp.float32)
        out_ref[...] = jnp.maximum(o + bu_ref[...], 0.0).astype(out_ref.dtype)

    return kernel


# ---------------------------------------------------------------------------
# Host-side weight packing (call ONCE; kernel only ever sees packed arrays)
# ---------------------------------------------------------------------------
def _banded_conv_weight(w_oihw, W):
    """(Cout, Cin, 3, 3) OIHW -> (3*W*Cin, W*Cout), horizontal pad folded in.

    Row block kh (size W*Cin) multiplies input row h+kh-1 flattened as
    (win*Cin + ci); column layout is (w*Cout + co).
    """
    T = jnp.transpose(w_oihw, (2, 3, 1, 0)).astype(jnp.float32)   # (kh,kw,ci,co)
    Cin, Cout = T.shape[2], T.shape[3]
    mats = []
    for kh in range(3):
        m = jnp.zeros((W * Cin, W * Cout), jnp.float32)
        for kw in range(3):
            sel = jnp.eye(W, W, k=1 - kw, dtype=jnp.float32)   # [w+kw-1, w] = 1
            m = m + jnp.kron(sel, T[kh, kw])
        mats.append(m)
    return jnp.concatenate(mats, axis=0)


def _packed_upsample_weight(wt, W):
    """(Cin, Cout, 2, 2) ConvTranspose2d weight -> (W*Cin, 4*W*Cout).

    column index = di*(2*W*Cout) + (2*w+dj)*Cout + co ; row = w*Cin + ci.
    """
    Cin, Cout = wt.shape[0], wt.shape[1]
    halves = []
    for di in range(2):
        t = jnp.zeros((W * Cin, 2 * W * Cout), jnp.float32)
        for dj in range(2):
            sel = jnp.zeros((W, 2 * W), jnp.float32)
            sel = sel.at[jnp.arange(W), 2 * jnp.arange(W) + dj].set(1.0)
            t = t + jnp.kron(sel, wt[:, :, di, dj].astype(jnp.float32))
        halves.append(t)
    return jnp.concatenate(halves, axis=1)


def pack_params(params, W):
    """Fold BN1 into conv1, BN2 into the upsample matmul, pack & cast to bf16."""
    Cout = params["w1"].shape[0]
    hp = lax.Precision.HIGHEST

    # conv1 bias + BN1 (inference) fold
    s1 = params["s1"]
    w1f = params["w1"] * s1[:, None, None, None]
    t1f = params["b1"] * s1 + params["t1"]

    w1cat = _banded_conv_weight(w1f, W)                  # (3*W*C2,   W*Cout)
    w2cat = _banded_conv_weight(params["w2"], W)         # (3*W*Cout, W*Cout)
    wu = _packed_upsample_weight(params["wt"], W)        # (W*Cout, 4*W*Cout)

    # BN2 fold: (y2*s2 + t2) @ wu + bu  ==  y2 @ (s2_row*wu) + (t2_row@wu + bu)
    s2row = jnp.tile(params["s2"], W)                    # (W*Cout,)
    t2row = jnp.tile(params["t2"], W).reshape(1, -1)     # (1, W*Cout)
    bu = jnp.tile(params["bt"].reshape(1, Cout), (1, 4 * W))
    wu_f = wu * s2row[:, None]
    bu_f = bu + jnp.matmul(t2row, wu, precision=hp)

    return {
        "w1": w1cat.astype(jnp.bfloat16),
        "t1": jnp.tile(t1f.reshape(1, Cout), (1, W)).astype(jnp.float32),
        "w2": w2cat.astype(jnp.bfloat16),
        "b2": jnp.tile(params["b2"].reshape(1, Cout), (1, W)).astype(jnp.float32),
        "wu": wu_f.astype(jnp.bfloat16),
        "bu": bu_f.astype(jnp.float32),
    }


# ---------------------------------------------------------------------------
# Wrapper
# ---------------------------------------------------------------------------
def res_block_upsample(x, residual, packed, *, nb=None):
    """x, residual: NCHW float32. Returns NCHW (N, Cout, 2H, 2W)."""
    N, Cin, H, W = x.shape
    C2 = 2 * Cin
    Cout = packed["w1"].shape[1] // W

    # Batch rows per grid step: stack batch into matmul M but keep >=2
    # 'parallel' grid steps when possible (v7x has 2 TensorCores).
    if nb is None:
        nb = max(1, N // 2)
    while N % nb != 0:
        nb -= 1
    steps = N // nb

    # torchvision center_crop(residual, x.shape[2]) -- pure slicing (glue)
    rh, rw = residual.shape[2], residual.shape[3]
    top = int(round((rh - H) / 2.0))
    left = int(round((rw - W) / 2.0))
    res = residual[:, :, top:top + H, left:left + W]

    # concat channels, NCHW -> NHWC, flatten rows to (W*C2) (no W padding:
    # it is folded into the banded weights); then vertical (kh) im2row.
    cat = jnp.concatenate([x, res], axis=1)                       # (N, 2Cin, H, W)
    cat = jnp.transpose(cat, (0, 2, 3, 1)).reshape(N, H, W * C2)  # (N, H, W*C2)
    catp = jnp.pad(cat, ((0, 0), (1, 1), (0, 0)))                 # (N, H+2, W*C2)
    xcat = jnp.concatenate([catp[:, kh:kh + H, :] for kh in range(3)],
                           axis=-1).astype(jnp.bfloat16)          # (N, H, 3*W*C2)

    K1 = 3 * W * C2
    WCo = W * Cout
    K2 = 3 * WCo
    NU = 4 * WCo

    out2d = pl.pallas_call(
        _make_kernel(nb, H, W, C2, Cout),
        out_shape=jax.ShapeDtypeStruct((N * H, NU), jnp.float32),
        grid=(steps,),
        in_specs=[
            pl.BlockSpec((nb, H, K1), lambda n: (n, 0, 0)),
            pl.BlockSpec((K1, WCo), lambda n: (0, 0)),
            pl.BlockSpec((1, WCo), lambda n: (0, 0)),
            pl.BlockSpec((K2, WCo), lambda n: (0, 0)),
            pl.BlockSpec((1, WCo), lambda n: (0, 0)),
            pl.BlockSpec((WCo, NU), lambda n: (0, 0)),
            pl.BlockSpec((1, NU), lambda n: (0, 0)),
        ],
        out_specs=pl.BlockSpec((nb * H, NU), lambda n: (n, 0)),
        compiler_params=pltpu.CompilerParams(
            dimension_semantics=("parallel",)),
    )(xcat, packed["w1"], packed["t1"], packed["w2"], packed["b2"],
      packed["wu"], packed["bu"])

    # Rows are (n, h)-major; columns are (di, 2w+dj, co)-minor, so this reshape
    # IS the depth-to-space (contiguous, free); one transpose -> NCHW.
    out = out2d.reshape(N, 2 * H, 2 * W, Cout)
    return jnp.transpose(out, (0, 3, 1, 2))


# ---------------------------------------------------------------------------
# Pure-JAX reference (f32 HIGHEST) mirroring the PyTorch forward
# ---------------------------------------------------------------------------
def ref_forward(x, residual, params):
    H, W = x.shape[2], x.shape[3]
    rh, rw = residual.shape[2], residual.shape[3]
    top = int(round((rh - H) / 2.0))
    left = int(round((rw - W) / 2.0))
    res = residual[:, :, top:top + H, left:left + W]
    out = jnp.concatenate([x, res], axis=1)

    dn = ("NCHW", "OIHW", "NCHW")
    out = lax.conv_general_dilated(out, params["w1"], (1, 1), ((1, 1), (1, 1)),
                                   dimension_numbers=dn,
                                   precision=lax.Precision.HIGHEST)
    out = out + params["b1"][None, :, None, None]
    out = out * params["s1"][None, :, None, None] + params["t1"][None, :, None, None]
    out = jnp.maximum(out, 0.0)
    out = lax.conv_general_dilated(out, params["w2"], (1, 1), ((1, 1), (1, 1)),
                                   dimension_numbers=dn,
                                   precision=lax.Precision.HIGHEST)
    out = out + params["b2"][None, :, None, None]
    out = jnp.maximum(out, 0.0)
    out = out * params["s2"][None, :, None, None] + params["t2"][None, :, None, None]
    # ConvTranspose2d(k=2, s=2, p=0) == lhs-dilated conv with flipped kernel
    w_conv = jnp.transpose(params["wt"], (1, 0, 2, 3))[:, :, ::-1, ::-1]
    out = lax.conv_general_dilated(out, w_conv, (1, 1), ((1, 1), (1, 1)),
                                   lhs_dilation=(2, 2), dimension_numbers=dn,
                                   precision=lax.Precision.HIGHEST)
    out = out + params["bt"][None, :, None, None]
    out = jnp.maximum(out, 0.0)
    return out


if __name__ == "__main__":
    key = jax.random.PRNGKey(0)
    N, Cin, Cout, H, W = 2, 4, 8, 16, 16
    RH, RW = 20, 20
    ks = jax.random.split(key, 16)

    x = jax.random.normal(ks[0], (N, Cin, H, W), jnp.float32)
    residual = jax.random.normal(ks[1], (N, Cin, RH, RW), jnp.float32)

    C2 = 2 * Cin
    eps = 1e-5

    def mk(k, shape, scale=0.1):
        return scale * jax.random.normal(k, shape, jnp.float32)

    # BatchNorm parameters (deterministic), folded to scale/shift (inference)
    g1 = 1.0 + mk(ks[8], (Cout,))
    be1 = mk(ks[9], (Cout,))
    rm1 = mk(ks[10], (Cout,))
    rv1 = 1.0 + 0.1 * jnp.abs(jax.random.normal(ks[11], (Cout,), jnp.float32))
    g2 = 1.0 + mk(ks[12], (Cout,))
    be2 = mk(ks[13], (Cout,))
    rm2 = mk(ks[14], (Cout,))
    rv2 = 1.0 + 0.1 * jnp.abs(jax.random.normal(ks[15], (Cout,), jnp.float32))
    s1 = g1 / jnp.sqrt(rv1 + eps)
    t1 = be1 - rm1 * s1
    s2 = g2 / jnp.sqrt(rv2 + eps)
    t2 = be2 - rm2 * s2

    params = {
        "w1": mk(ks[2], (Cout, C2, 3, 3)),        # Conv2d(2*Cin, Cout, 3, 1, 1)
        "b1": mk(ks[3], (Cout,)),
        "w2": mk(ks[4], (Cout, Cout, 3, 3)),      # Conv2d(Cout, Cout, 3, 1, 1)
        "b2": mk(ks[5], (Cout,)),
        "wt": mk(ks[6], (Cout, Cout, 2, 2)),      # ConvTranspose2d(Cout, Cout, 2, 2)
        "bt": mk(ks[7], (Cout,)),
        "s1": s1, "t1": t1, "s2": s2, "t2": t2,
    }

    # Pack/fold weights ONCE (outside the jitted per-call forward).
    packed = jax.tree_util.tree_map(jax.block_until_ready, pack_params(params, W))

    fwd = jax.jit(res_block_upsample)
    out = jax.block_until_ready(fwd(x, residual, packed))
    ref = jax.block_until_ready(ref_forward(x, residual, params))

    assert out.shape == (N, Cout, 2 * H, 2 * W), out.shape
    max_err = float(jnp.max(jnp.abs(out - ref)))
    # Kernel runs bf16 weights/activations on the MXU with f32 accumulation;
    # reference is f32 HIGHEST -> tolerance 3e-2 (sanctioned by the review).
    assert jnp.allclose(out, ref, rtol=3e-2, atol=3e-2), max_err
    print("KERNEL_OK")
</pallas_src>

<mosaic_0001>
module attributes {stable_mosaic.version = 11 : i64} {
  func.func @kernel(%arg0: i32, %arg1: memref<1x16x384xbf16, #tpu.memory_space<vmem>>, %arg2: memref<384x128xbf16, #tpu.memory_space<vmem>>, %arg3: memref<1x128xf32, #tpu.memory_space<vmem>>, %arg4: memref<384x128xbf16, #tpu.memory_space<vmem>>, %arg5: memref<1x128xf32, #tpu.memory_space<vmem>>, %arg6: memref<128x512xbf16, #tpu.memory_space<vmem>>, %arg7: memref<1x512xf32, #tpu.memory_space<vmem>>, %arg8: memref<16x512xf32, #tpu.memory_space<vmem>>) attributes {dimension_semantics = [#tpu.dimension_semantics<parallel>], iteration_bounds = array<i64: 2>, scalar_prefetch = 0 : i64, scratch_operands = 0 : i64, tpu.core_type = #tpu.core_type<tc>, window_params = [{transform_indices = @transform_0, window_bounds = array<i64: 1, 16, 384>}, {pipeline_mode = #tpu.pipeline_mode<synchronous>, transform_indices = @transform_1, window_bounds = array<i64: 384, 128>}, {pipeline_mode = #tpu.pipeline_mode<synchronous>, transform_indices = @transform_2, window_bounds = array<i64: 1, 128>}, {pipeline_mode = #tpu.pipeline_mode<synchronous>, transform_indices = @transform_3, window_bounds = array<i64: 384, 128>}, {pipeline_mode = #tpu.pipeline_mode<synchronous>, transform_indices = @transform_4, window_bounds = array<i64: 1, 128>}, {pipeline_mode = #tpu.pipeline_mode<synchronous>, transform_indices = @transform_5, window_bounds = array<i64: 128, 512>}, {pipeline_mode = #tpu.pipeline_mode<synchronous>, transform_indices = @transform_6, window_bounds = array<i64: 1, 512>}, {transform_indices = @transform_7, window_bounds = array<i64: 16, 512>}]} {
    %c0 = arith.constant 0 : index
    %c0_0 = arith.constant 0 : index
    %c0_1 = arith.constant 0 : index
    %0 = vector.load %arg1[%c0, %c0_0, %c0_1] : memref<1x16x384xbf16, #tpu.memory_space<vmem>>, vector<1x16x384xbf16>
    %1 = vector.shape_cast %0 : vector<1x16x384xbf16> to vector<16x384xbf16>
    %c0_2 = arith.constant 0 : index
    %c0_3 = arith.constant 0 : index
    %2 = vector.load %arg2[%c0_2, %c0_3] : memref<384x128xbf16, #tpu.memory_space<vmem>>, vector<384x128xbf16>
    %cst = arith.constant dense<0.000000e+00> : vector<16x128xf32>
    %3 = tpu.matmul %1, %2, %cst {dimension_numbers = #tpu.dot_dimension_numbers<[1], [0], [0], [1], [0, 0, 1, 1], [], []>} : vector<16x384xbf16>, vector<384x128xbf16>, vector<16x128xf32> -> vector<16x128xf32>
    %c0_4 = arith.constant 0 : index
    %c0_5 = arith.constant 0 : index
    %4 = vector.load %arg3[%c0_4, %c0_5] : memref<1x128xf32, #tpu.memory_space<vmem>>, vector<1x128xf32>
    %5 = vector.broadcast %4 : vector<1x128xf32> to vector<16x128xf32>
    %6 = arith.addf %3, %5 : vector<16x128xf32>
    %cst_6 = arith.constant 0.000000e+00 : f32
    %7 = vector.broadcast %cst_6 : f32 to vector<16x128xf32>
    %8 = arith.maximumf %6, %7 : vector<16x128xf32>
    %9 = arith.truncf %8 : vector<16x128xf32> to vector<16x128xbf16>
    %10 = vector.shape_cast %9 : vector<16x128xbf16> to vector<1x16x128xbf16>
    %cst_7 = arith.constant 0.000000e+00 : bf16
    %11 = vector.broadcast %cst_7 : bf16 to vector<1x1x128xbf16>
    %12 = tpu.concatenate %11, %10, %11 in 1 : vector<1x1x128xbf16>, vector<1x16x128xbf16>, vector<1x1x128xbf16> -> vector<1x18x128xbf16>
    %13 = vector.extract_strided_slice %12 {offsets = [0, 0, 0], sizes = [1, 16, 128], strides = [1, 1, 1]} : vector<1x18x128xbf16> to vector<1x16x128xbf16>
    %14 = vector.extract_strided_slice %12 {offsets = [0, 1, 0], sizes = [1, 16, 128], strides = [1, 1, 1]} : vector<1x18x128xbf16> to vector<1x16x128xbf16>
    %15 = vector.extract_strided_slice %12 {offsets = [0, 2, 0], sizes = [1, 16, 128], strides = [1, 1, 1]} : vector<1x18x128xbf16> to vector<1x16x128xbf16>
    %16 = tpu.concatenate %13, %14, %15 in 2 : vector<1x16x128xbf16>, vector<1x16x128xbf16>, vector<1x16x128xbf16> -> vector<1x16x384xbf16>
    %17 = vector.shape_cast %16 : vector<1x16x384xbf16> to vector<16x384xbf16>
    %c0_8 = arith.constant 0 : index
    %c0_9 = arith.constant 0 : index
    %18 = vector.load %arg4[%c0_8, %c0_9] : memref<384x128xbf16, #tpu.memory_space<vmem>>, vector<384x128xbf16>
    %cst_10 = arith.constant dense<0.000000e+00> : vector<16x128xf32>
    %19 = tpu.matmul %17, %18, %cst_10 {dimension_numbers = #tpu.dot_dimension_numbers<[1], [0], [0], [1], [0, 0, 1, 1], [], []>} : vector<16x384xbf16>, vector<384x128xbf16>, vector<16x128xf32> -> vector<16x128xf32>
    %c0_11 = arith.constant 0 : index
    %c0_12 = arith.constant 0 : index
    %20 = vector.load %arg5[%c0_11, %c0_12] : memref<1x128xf32, #tpu.memory_space<vmem>>, vector<1x128xf32>
    %21 = vector.broadcast %20 : vector<1x128xf32> to vector<16x128xf32>
    %22 = arith.addf %19, %21 : vector<16x128xf32>
    %cst_13 = arith.constant 0.000000e+00 : f32
    %23 = vector.broadcast %cst_13 : f32 to vector<16x128xf32>
    %24 = arith.maximumf %22, %23 : vector<16x128xf32>
    %25 = arith.truncf %24 : vector<16x128xf32> to vector<16x128xbf16>
    %c0_14 = arith.constant 0 : index
    %c0_15 = arith.constant 0 : index
    %26 = vector.load %arg6[%c0_14, %c0_15] : memref<128x512xbf16, #tpu.memory_space<vmem>>, vector<128x512xbf16>
    %cst_16 = arith.constant dense<0.000000e+00> : vector<16x512xf32>
    %27 = tpu.matmul %25, %26, %cst_16 {dimension_numbers = #tpu.dot_dimension_numbers<[1], [0], [0], [1], [0, 0, 1, 1], [], []>} : vector<16x128xbf16>, vector<128x512xbf16>, vector<16x512xf32> -> vector<16x512xf32>
    %c0_17 = arith.constant 0 : index
    %c0_18 = arith.constant 0 : index
    %28 = vector.load %arg7[%c0_17, %c0_18] : memref<1x512xf32, #tpu.memory_space<vmem>>, vector<1x512xf32>
    %29 = vector.broadcast %28 : vector<1x512xf32> to vector<16x512xf32>
    %30 = arith.addf %27, %29 : vector<16x512xf32>
    %cst_19 = arith.constant 0.000000e+00 : f32
    %31 = vector.broadcast %cst_19 : f32 to vector<16x512xf32>
    %32 = arith.maximumf %30, %31 : vector<16x512xf32>
    %c0_20 = arith.constant 0 : index
    %c0_21 = arith.constant 0 : index
    %33 = vector.load %arg8[%c0_20, %c0_21] : memref<16x512xf32, #tpu.memory_space<vmem>>, vector<16x512xf32>
    tpu.vector_store %arg8[%c0_20, %c0_21], %32 {strides = array<i32>} : memref<16x512xf32, #tpu.memory_space<vmem>>, vector<16x512xf32>,
    return
  }
  func.func @transform_0(%arg0: i32) -> (i32, i32, i32) {
    %c0_i32 = arith.constant 0 : i32
    %c0_i32_0 = arith.constant 0 : i32
    %c0_i32_1 = arith.constant 0 : i32
    return %arg0, %c0_i32, %c0_i32_0 : i32, i32, i32
  }
  func.func @transform_1(%arg0: i32) -> (i32, i32) {
    %c0_i32 = arith.constant 0 : i32
    %c0_i32_0 = arith.constant 0 : i32
    %c0_i32_1 = arith.constant 0 : i32
    return %c0_i32, %c0_i32_0 : i32, i32
  }
  func.func @transform_2(%arg0: i32) -> (i32, i32) {
    %c0_i32 = arith.constant 0 : i32
    %c0_i32_0 = arith.constant 0 : i32
    %c0_i32_1 = arith.constant 0 : i32
    return %c0_i32, %c0_i32_0 : i32, i32
  }
  func.func @transform_3(%arg0: i32) -> (i32, i32) {
    %c0_i32 = arith.constant 0 : i32
    %c0_i32_0 = arith.constant 0 : i32
    %c0_i32_1 = arith.constant 0 : i32
    return %c0_i32, %c0_i32_0 : i32, i32
  }
  func.func @transform_4(%arg0: i32) -> (i32, i32) {
    %c0_i32 = arith.constant 0 : i32
    %c0_i32_0 = arith.constant 0 : i32
    %c0_i32_1 = arith.constant 0 : i32
    return %c0_i32, %c0_i32_0 : i32, i32
  }
  func.func @transform_5(%arg0: i32) -> (i32, i32) {
    %c0_i32 = arith.constant 0 : i32
    %c0_i32_0 = arith.constant 0 : i32
    %c0_i32_1 = arith.constant 0 : i32
    return %c0_i32, %c0_i32_0 : i32, i32
  }
  func.func @transform_6(%arg0: i32) -> (i32, i32) {
    %c0_i32 = arith.constant 0 : i32
    %c0_i32_0 = arith.constant 0 : i32
    %c0_i32_1 = arith.constant 0 : i32
    return %c0_i32, %c0_i32_0 : i32, i32
  }
  func.func @transform_7(%arg0: i32) -> (i32, i32) {
    %c0_i32 = arith.constant 0 : i32
    %c0_i32_0 = arith.constant 0 : i32
    return %arg0, %c0_i32 : i32, i32
  }
}

</mosaic_0001>

<bundles_post_ra>
// kernel: res_block_upsample.1
= control target key start
LH: loop header
LB: loop body
LE: loop exit
PB: predicated region body
PF: predicated region fallthrough
CT: control target
= control target key end

     0   :  { %s1642_s24 = smov 0   ;;  %s1933_s0 = inlined_call_operand.vmem [shape: bf16[2,16,384], index: 0, kind: input, shape index: {}]   ;;  %s1934_s1 = inlined_call_operand.vmem [shape: bf16[384,128], index: 1, kind: input, shape index: {}]   ;;  %s1935_s2 = inlined_call_operand.vmem [shape: f32[1,128], index: 2, kind: input, shape index: {}]   ;;  %s1936_s3 = inlined_call_operand.vmem [shape: bf16[384,128], index: 3, kind: input, shape index: {}]   ;;  %s1937_s4 = inlined_call_operand.vmem [shape: f32[1,128], index: 4, kind: input, shape index: {}]   ;;  %s1938_s5 = inlined_call_operand.vmem [shape: bf16[128,512], index: 5, kind: input, shape index: {}]   ;;  %s1939_s6 = inlined_call_operand.vmem [shape: f32[1,512], index: 6, kind: input, shape index: {}]   ;;  %s1940_s7 = inlined_call_operand.vmem [shape: f32[32,512], index: 7, kind: output, shape index: {}]  }
   0x1 LB: > { %s1648_s25 = sadd.s32 4294967295, %s1597_s24   ;;  %p1284_p0 = scmp.ge.s32.totalorder %s1597_s24, 1  ;;  %s1597_s24 = sphi %s1642_s24, %s17_s24  }
   0x2   : > { %p237_p1 = scmp.lt.s32.totalorder %s1597_s24, 3 }
   0x4   : > { %p238_p2 = pnand %p1284_p0, %p237_p1 }
   0x5   : > { %p270_p3 = scmp.lt.s32.totalorder (!%p238_p2), %s1648_s25, 1  ;;  %s1286_s27 = sshll.u32 (!%p238_p2), %s1648_s25, 1 }
   0x6   : > { %241 = sbr.rel (%p238_p2) target bundleno = 681 (0x2a9), region = 48  ;;  %p276_p4 = scmp.lt.s32.totalorder (!%p238_p2), %s1286_s27, 3 }
   0xb   : > { %v1491_v0 = vld [vmem:[%s1934_s1 + $0x78] sm:$0xff]   ;;  %v1599_v1 = vmov 0.0   ;;  %v1494_v4 = vld [vmem:[%s1934_s1 + $0x70] sm:$0xff]   ;;  %vm1600_vm0 = vmmov 0   ;;  %v1497_v7 = vld [vmem:[%s1934_s1 + $0x68] sm:$0xff]   ;;  %s271_s10 = scalar_select %p270_p3, %s1648_s25, 1 }
   0xc   : > { %1439 = vmatprep.subr.bf16.mxu1 %v1599_v1  ;;  %v1492_v2 = vld [vmem:[%s1934_s1 + $0x38] sm:$0xff]   ;;  %1377 = vmatprep.subr.bf16.mxu0 %v1491_v0  ;;  %v1495_v5 = vld [vmem:[%s1934_s1 + $0x30] sm:$0xff]   ;;  %v1498_v8 = vld [vmem:[%s1934_s1 + $0x28] sm:$0xff]   ;;  %vm596_vm1 = vcmask 1040384   ;;  %vm597_vm2 = vsmask.f32 256 }
   0xd   : > { %v1493_v3 = vld [vmem:[%s1934_s1 + $0xb8] sm:$0xff]   ;;  %1378 = vmatpush3.bf16.msra.mxu0 %v1492_v2  ;;  %1455 = vmatprep.mubr.msk.bf16.mxu1 %vm1600_vm0, %v1599_v1  ;;  %v1496_v6 = vld [vmem:[%s1934_s1 + $0xb0] sm:$0xff]   ;;  %v1499_v9 = vld [vmem:[%s1934_s1 + $0xa8] sm:$0xff]   ;;  %s1479_s17 = smul.u32 24, %s271_s10  ;;  %vm617_vm4 = vcmask 1046528   ;;  %s1942_s27 = smov (!%p276_p4, %s1286_s27), 3 }
   0xe   : > { %1440 = vmatpush3.bf16.msra.mxu1 %v1493_v3  ;;  %1379 = vmatprep.subr.bf16.mxu0 %v1494_v4  ;;  %v1500_v10 = vld [vmem:[%s1934_s1 + $0x60] sm:$0xff]   ;;  %v1503_v13 = vld [vmem:[%s1934_s1 + $0x58] sm:$0xff]   ;;  %v1506_v16 = vld [vmem:[%s1934_s1 + $0x50] sm:$0xff]   ;;  %vm601_vm5 = vsmask.f32 7424  ;;  %s1376_s30 = sshll.u32 %s1942_s27, 5 }
   0xf   : > { %1441 = vmatprep.subr.bf16.mxu1 %v1599_v1  ;;  %v1501_v11 = vld [vmem:[%s1934_s1 + $0x20] sm:$0xff]   ;;  %v1504_v14 = vld [vmem:[%s1934_s1 + $0x18] sm:$0xff]   ;;  %v1507_v17 = vld [vmem:[%s1934_s1 + $0x10] sm:$0xff]   ;;  %s274_s28 = scalar_lea.vmem %s1933_s0, %s1479_s17  ;;  %s280_s9 = scalar_lea.vmem %s1940_s7, %s1376_s30 }
  0x10   : > { %v1502_v12 = vld [vmem:[%s1934_s1 + $0xa0] sm:$0xff]   ;;  %v1505_v15 = vld [vmem:[%s1934_s1 + $0x98] sm:$0xff]   ;;  %v1508_v18 = vld [vmem:[%s1934_s1 + $0x90] sm:$0xff]  }
  0x11   : > { %1380 = vmatpush3.bf16.msra.mxu0 %v1495_v5  ;;  %v1509_v19 = vld [vmem:[%s1934_s1 + $0x48] sm:$0xff]   ;;  %v1512_v22 = vld [vmem:[%s1934_s1 + $0x40] sm:$0xff]   ;;  %v1519_v28 = vld [vmem:[%s1936_s3 + $0xb8] sm:$0xff]  }
  0x12   : > { %1442 = vmatpush3.bf16.msra.mxu1 %v1496_v6  ;;  %1381 = vmatprep.subr.bf16.mxu0 %v1497_v7  ;;  %v1510_v20 = vld [vmem:[%s1934_s1 + $0x8] sm:$0xff]   ;;  %v1517_v23 = vld [vmem:[%s274_s28 + $0x4] ss:$12 sps:$4 sm:$0xff]   ;;  %v1520_v29 = vld [vmem:[%s1936_s3 + $0x78] sm:$0xff]  }
  0x13   : > { %1443 = vmatprep.subr.bf16.mxu1 %v1599_v1  ;;  %v1511_v21 = vld [vmem:[%s1934_s1 + $0x88] sm:$0xff]   ;;  %v1513_v24 = vld [vmem:[%s1934_s1] sm:$0xff]   ;;  %534 = vmatprep.mubr.bf16.mxu0 %v1517_v23  ;;  %v1521_v30 = vld [vmem:[%s1936_s3 + $0xb0] sm:$0xff]  }
  0x14   : > { %v1514_v25 = vld [vmem:[%s1934_s1 + $0x80] sm:$0xff]   ;;  %v1518_v27 = vld [vmem:[%s274_s28 + $0x8] ss:$12 sps:$4 sm:$0xff]   ;;  %v1522_v31 = vld [vmem:[%s1936_s3 + $0x38] sm:$0xff]  }
  0x15   : > { %1382 = vmatpush3.bf16.msra.mxu0 %v1498_v8  ;;  %v1515_v26 = vld [vmem:[%s274_s28] ss:$12 sps:$4 sm:$0xff]   ;;  %v1523_v32 = vld [vmem:[%s1936_s3 + $0x70] sm:$0xff]   ;;  %v1530_v39 = vld [vmem:[%s1936_s3 + $0x98] sm:$0xff]  }
  0x16   : > { %1444 = vmatpush3.bf16.msra.mxu1 %v1499_v9  ;;  %1383 = vmatprep.subr.bf16.mxu0 %v1500_v10  ;;  %v1524_v33 = vld [vmem:[%s1936_s3 + $0xa8] sm:$0xff]   ;;  %v1525_v34 = vld [vmem:[%s1936_s3 + $0x30] sm:$0xff]   ;;  %v1527_v36 = vld [vmem:[%s1936_s3 + $0xa0] sm:$0xff]  }
  0x17   : > { %1445 = vmatprep.subr.bf16.mxu1 %v1599_v1  ;;  %v1526_v35 = vld [vmem:[%s1936_s3 + $0x68] sm:$0xff]   ;;  %v1529_v38 = vld [vmem:[%s1936_s3 + $0x60] sm:$0xff]   ;;  %v1532_v41 = vld [vmem:[%s1936_s3 + $0x58] sm:$0xff]  }
  0x18   : > { %v1528_v37 = vld [vmem:[%s1936_s3 + $0x28] sm:$0xff]   ;;  %v1531_v40 = vld [vmem:[%s1936_s3 + $0x20] sm:$0xff]   ;;  %v1533_v42 = vld [vmem:[%s1936_s3 + $0x90] sm:$0xff]  }
  0x19   : > { %1384 = vmatpush3.bf16.msra.mxu0 %v1501_v11  ;;  %v1534_v43 = vld [vmem:[%s1936_s3 + $0x18] sm:$0xff]   ;;  %v1535_v44 = vld [vmem:[%s1936_s3 + $0x50] sm:$0xff]   ;;  %v1536_v45 = vld [vmem:[%s1936_s3 + $0x88] sm:$0xff]  }
  0x1a   : > { %1446 = vmatpush3.bf16.msra.mxu1 %v1502_v12  ;;  %1385 = vmatprep.subr.bf16.mxu0 %v1503_v13  ;;  %v1537_v46 = vld [vmem:[%s1936_s3 + $0x10] sm:$0xff]   ;;  %v1538_v47 = vld [vmem:[%s1936_s3 + $0x48] sm:$0xff]   ;;  %v1539_v48 = vld [vmem:[%s1936_s3 + $0x80] sm:$0xff]  }
  0x1b   : > { %1447 = vmatprep.subr.bf16.mxu1 %v1599_v1  ;;  %v1540_v49 = vld [vmem:[%s1936_s3 + $0x8] sm:$0xff]   ;;  %v1541_v50 = vld [vmem:[%s1936_s3 + $0x40] sm:$0xff]   ;;  %vm598_vm3 = vmand %vm596_vm1, %vm597_vm2 }
  0x1c   : > { %v1542_v51 = vld [vmem:[%s1936_s3] sm:$0xff]   ;;  %v1548_v53 = vld [vmem:[%s1938_s5 + $0xec] ss:$16 sps:$4 sm:$0xff]  }
  0x1d   : > { %1386 = vmatpush3.bf16.msra.mxu0 %v1504_v14  ;;  %v1545_v52 = vld [vmem:[%s1938_s5 + $0xe4] ss:$16 sps:$4 sm:$0xff]   ;;  %v1289_v56 = vld [vmem:[%s1935_s2] ss:$0 sm:$0xff] }
  0x1e   : > { %1448 = vmatpush3.bf16.msra.mxu1 %v1505_v15  ;;  %1387 = vmatprep.subr.bf16.mxu0 %v1506_v16 }
  0x1f   : > { %1449 = vmatprep.subr.bf16.mxu1 %v1599_v1 }
  0x21   : > { %1388 = vmatpush3.bf16.msra.mxu0 %v1507_v17 }
  0x22   : > { %1450 = vmatpush3.bf16.msra.mxu1 %v1508_v18  ;;  %1389 = vmatprep.subr.bf16.mxu0 %v1509_v19  ;;  %v1546_v18 = vld [vmem:[%s1938_s5 + $0xe8] ss:$16 sps:$4 sm:$0xff]   ;;  %v1554_v19 = vld [vmem:[%s1938_s5 + $0xcc] ss:$16 sps:$4 sm:$0xff]  }
  0x23   : > { %1451 = vmatprep.subr.bf16.mxu1 %v1599_v1 }
  0x25   : > { %1390 = vmatpush3.bf16.msra.mxu0 %v1510_v20 }
  0x26   : > { %1452 = vmatpush3.bf16.msra.mxu1 %v1511_v21  ;;  %1391 = vmatprep.subr.bf16.mxu0 %v1512_v22 }
  0x27   : > { %1453 = vmatprep.subr.bf16.mxu1 %v1599_v1 }
  0x29   : > { %1392 = vmatpush3.bf16.msra.mxu0 %v1513_v24 }
  0x2a   : > { %1454 = vmatpush3.bf16.msra.mxu1 %v1514_v25  ;;  %1408 = vmatprep.subr.bf16.mxu0 %v1520_v29  ;;  %v1552_v25 = vld [vmem:[%s1938_s5 + $0xc8] ss:$16 sps:$4 sm:$0xff]   ;;  %v1551_v29 = vld [vmem:[%s1938_s5 + $0xc4] ss:$16 sps:$4 sm:$0xff]  }
  0x2b   : > { %1459 = vmatprep.subr.bf16.mxu1 %v1599_v1 }
  0x2c   : > { %535 = vmatmul.mubr.bf16.vlgmr.msra.gmra.mxu0 %v1515_v26  ;;  %v1543_v26 = vld [vmem:[%s1938_s5 + $0xe0] ss:$16 sps:$4 sm:$0xff]  }
  0x2d   : > { %1456 = vmatmul.mubr.bf16.vlgmr.msra.gmra.mxu1 %v1518_v27  ;;  %1409 = vmatpush3.bf16.msra.mxu0 %v1522_v31  ;;  %v1560_v27 = vld [vmem:[%s1938_s5 + $0xac] ss:$16 sps:$4 sm:$0xff]   ;;  %v1549_v31 = vld [vmem:[%s1938_s5 + $0xc0] ss:$16 sps:$4 sm:$0xff]  }
  0x2e   : > { %1460 = vmatpush3.bf16.msra.mxu1 %v1519_v28  ;;  %1475 = vmatprep.mubr.msk.bf16.mxu1 %vm1600_vm0, %v1599_v1 }
  0x2f   : > { %1461 = vmatprep.subr.bf16.mxu1 %v1599_v1  ;;  %1410 = vmatprep.subr.bf16.mxu0 %v1523_v32  ;;  %v1557_v32 = vld [vmem:[%s1938_s5 + $0xa4] ss:$16 sps:$4 sm:$0xff]  }
  0x31   : > { %1411 = vmatpush3.bf16.msra.mxu0 %v1525_v34  ;;  %v1563_v34 = vld [vmem:[%s1938_s5 + $0x84] ss:$16 sps:$4 sm:$0xff]  }
  0x32   : > { %1462 = vmatpush3.bf16.msra.mxu1 %v1521_v30  ;;  %1412 = vmatprep.subr.bf16.mxu0 %v1526_v35  ;;  %v1558_v30 = vld [vmem:[%s1938_s5 + $0xa8] ss:$16 sps:$4 sm:$0xff]   ;;  %v1566_v35 = vld [vmem:[%s1938_s5 + $0x8c] ss:$16 sps:$4 sm:$0xff]  }
  0x33   : > { %1463 = vmatprep.subr.bf16.mxu1 %v1599_v1 }
  0x35   : > { %1413 = vmatpush3.bf16.msra.mxu0 %v1528_v37  ;;  %v1564_v37 = vld [vmem:[%s1938_s5 + $0x88] ss:$16 sps:$4 sm:$0xff]  }
  0x36   : > { %1464 = vmatpush3.bf16.msra.mxu1 %v1524_v33  ;;  %1414 = vmatprep.subr.bf16.mxu0 %v1529_v38  ;;  %v1555_v33 = vld [vmem:[%s1938_s5 + $0xa0] ss:$16 sps:$4 sm:$0xff]   ;;  %v1569_v38 = vld [vmem:[%s1938_s5 + $0x64] ss:$16 sps:$4 sm:$0xff]  }
  0x37   : > { %1465 = vmatprep.subr.bf16.mxu1 %v1599_v1 }
  0x39   : > { %1415 = vmatpush3.bf16.msra.mxu0 %v1531_v40  ;;  %v1567_v40 = vld [vmem:[%s1938_s5 + $0x60] ss:$16 sps:$4 sm:$0xff]  }
  0x3a   : > { %1466 = vmatpush3.bf16.msra.mxu1 %v1527_v36  ;;  %1416 = vmatprep.subr.bf16.mxu0 %v1532_v41  ;;  %v1561_v36 = vld [vmem:[%s1938_s5 + $0x80] ss:$16 sps:$4 sm:$0xff]   ;;  %v1570_v41 = vld [vmem:[%s1938_s5 + $0x68] ss:$16 sps:$4 sm:$0xff]  }
  0x3b   : > { %1467 = vmatprep.subr.bf16.mxu1 %v1599_v1 }
  0x3d   : > { %1417 = vmatpush3.bf16.msra.mxu0 %v1534_v43  ;;  %v1578_v43 = vld [vmem:[%s1938_s5 + $0x4c] ss:$16 sps:$4 sm:$0xff]  }
  0x3e   : > { %1468 = vmatpush3.bf16.msra.mxu1 %v1530_v39  ;;  %1418 = vmatprep.subr.bf16.mxu0 %v1535_v44  ;;  %v1572_v39 = vld [vmem:[%s1938_s5 + $0x6c] ss:$16 sps:$4 sm:$0xff]   ;;  %v1573_v44 = vld [vmem:[%s1938_s5 + $0x40] ss:$16 sps:$4 sm:$0xff]  }
  0x3f   : > { %1469 = vmatprep.subr.bf16.mxu1 %v1599_v1 }
  0x41   : > { %1419 = vmatpush3.bf16.msra.mxu0 %v1537_v46  ;;  %v1581_v46 = vld [vmem:[%s1938_s5 + $0x24] ss:$16 sps:$4 sm:$0xff]  }
  0x42   : > { %1470 = vmatpush3.bf16.msra.mxu1 %v1533_v42  ;;  %1420 = vmatprep.subr.bf16.mxu0 %v1538_v47  ;;  %v1575_v42 = vld [vmem:[%s1938_s5 + $0x44] ss:$16 sps:$4 sm:$0xff]   ;;  %v1584_v47 = vld [vmem:[%s1938_s5 + $0x2c] ss:$16 sps:$4 sm:$0xff]  }
  0x43   : > { %1471 = vmatprep.subr.bf16.mxu1 %v1599_v1 }
  0x45   : > { %1421 = vmatpush3.bf16.msra.mxu0 %v1540_v49  ;;  %v1582_v49 = vld [vmem:[%s1938_s5 + $0x28] ss:$16 sps:$4 sm:$0xff]  }
  0x46   : > { %1472 = vmatpush3.bf16.msra.mxu1 %v1536_v45  ;;  %1422 = vmatprep.subr.bf16.mxu0 %v1541_v50  ;;  %v1576_v45 = vld [vmem:[%s1938_s5 + $0x48] ss:$16 sps:$4 sm:$0xff]   ;;  %v1587_v50 = vld [vmem:[%s1938_s5 + $0x4] ss:$16 sps:$4 sm:$0xff]  }
  0x47   : > { %1473 = vmatprep.subr.bf16.mxu1 %v1599_v1 }
  0x49   : > { %1423 = vmatpush3.bf16.msra.mxu0 %v1542_v51  ;;  %v1590_v51 = vld [vmem:[%s1938_s5 + $0xc] ss:$16 sps:$4 sm:$0xff]  }
  0x4a   : > { %1474 = vmatpush3.bf16.msra.mxu1 %v1539_v48  ;;  %1120 = vmatprep.subr.bf16.mxu0 %v1545_v52  ;;  %v1579_v48 = vld [vmem:[%s1938_s5 + $0x20] ss:$16 sps:$4 sm:$0xff]  }
  0x4b   : > { %1163 = vmatprep.subr.bf16.mxu1 %v1548_v53  ;;  %v1585_v52 = vld [vmem:[%s1938_s5] ss:$16 sps:$4 sm:$0xff]   ;;  %v1588_v53 = vld [vmem:[%s1938_s5 + $0x8] ss:$16 sps:$4 sm:$0xff]  }
  0xec   : > { %v1393_v54 = vpop.f32.mrf.mxu0 }
  0xed   : > { %v577_v55 = vpop.f32.mrf.mxu1 }
  0xee   : > { %v1394_v57 = vpop.f32.mrf.mxu0 }
  0xef   : > { %v1395_v58 = vadd.f32 %v1394_v57, %v1393_v54  ;;  %v1457_v59 = vpop.f32.mrf.mxu1  ;;  %v1601_v54 = vmov 0  }
  0xf0   : > { %v1396_v60 = vpop.f32.mrf.mxu0 }
  0xf1   : > { %v537_v61 = vadd.f32 %v1395_v58, %v1289_v56  ;;  %v580_v62 = vpop.f32.mrf.mxu1 }
  0xf2   : > { %v1397_v63 = vpop.f32.mrf.mxu0 }
  0xf3   : > { %v1398_v0 = vadd.f32 %v1397_v63, %v1396_v60  ;;  %v1458_v1 = vpop.f32.mrf.mxu1  ;;  %v578_v2 = vadd.f32 %v577_v55, %v537_v61  ;;  %v1317_v60 = vld [vmem:[%s1937_s4] ss:$0 sm:$0xff] }
  0xf5   : > { %v540_v3 = vadd.f32 %v1398_v0, %v1289_v56  ;;  %v584_v5 = vmax.f32 %v578_v2, 0.0 }
  0xf7   : > { %v581_v4 = vadd.f32 %v580_v62, %v540_v3 }
  0xf9   : > { %v585_v6 = vmax.f32 %v581_v4, 0.0 }
  0xfb   : > { %v586_v7 = vpack.c.bf16 %v585_v6, %v584_v5 }
  0xfd   : > { %v588_v8 = vshrl.u32 %v586_v7, 16  ;;  %v591_v10 = vshll.u32 %v586_v7, 16 }
  0xff   : > { %v590_v9 = vrot.slane %v588_v8, 7 }
 0x101   : > { %v593_v11 = vor.u32 %v591_v10, %v590_v9  ;;  %v600_v12 = vsel %vm598_vm3, %v590_v9, 0  ;;  %v940_v9 = vlaneseq }
 0x102   : > { %v619_v15 = vrot.slane %v600_v12, 1  ;;  %v610_v17 = vshll.u32 %v600_v12, 16 }
 0x103   : > { %v599_v13 = vsel %vm598_vm3, 0, %v593_v11  ;;  %v941_v10 = vshrl.u32 %v940_v9, 7 }
 0x104   : > { %v618_v14 = vrot.slane %v599_v13, 1  ;;  %v605_v16 = vshll.u32 %v599_v13, 16  ;;  %v603_v21 = vshrl.u32 %v599_v13, 16  ;;  %v612_v24 = vrot.slane %v610_v17, 1 }
 0x105   : > { %v942_v11 = vsub.s32 0, %v941_v10  ;;  %v950_v12 = vsub.s32 2, %v941_v10 }
 0x106   : > { %v620_v20 = vsel %vm617_vm4, %v618_v14, %v619_v15  ;;  %v607_v22 = vrot.slane %v605_v16, 1  ;;  %v946_v14 = vsub.s32 1, %v941_v10  ;;  %v954_v15 = vsub.s32 3, %v941_v10 }
 0x107   : > { %1476 = vmatmul.mubr.bf16.vlgmr.msra.gmra.mxu1 %v620_v20 }
 0x108   : > { %v608_v23 = vor.u32 %v607_v22, %v603_v21  ;;  %1164 = vmatpush1.bf16.msra.mxu1 %v1546_v18  ;;  %1195 = vmatprep.mubr.bf16.mxu1 %v1601_v54 }
 0x109   : > { %1165 = vmatprep.subr.bf16.mxu1 %v1554_v19 }
 0x10a   : > { %v613_v28 = vsel %vm601_vm5, %v608_v23, %v612_v24 }
 0x10b   : > { %853 = vmatprep.mubr.bf16.mxu0 %v613_v28 }
 0x10c   : > { %854 = vmatmul.mubr.bf16.vlgmr.msra.gmra.mxu0 %v599_v13  ;;  %1166 = vmatpush1.bf16.msra.mxu1 %v1552_v25  ;;  %v938_v13 = vld [vmem:[%s1939_s6] sm:$0xf] }
 0x10d   : > { %1121 = vmatpush1.bf16.msra.mxu0 %v1543_v26  ;;  %1167 = vmatprep.subr.bf16.mxu1 %v1560_v27  ;;  %v943_v16 = vrot.slane %v938_v13, %v942_v11  ;;  %v951_v17 = vrot.slane %v938_v13, %v950_v12  ;;  %v947_v18 = vrot.slane %v938_v13, %v946_v14 }
 0x10e   : > { %1122 = vmatprep.subr.bf16.mxu0 %v1551_v29  ;;  %1152 = vmatprep.mubr.bf16.mxu0 %v1601_v54  ;;  %v955_v19 = vrot.slane %v938_v13, %v954_v15 }
 0x110   : > { %1168 = vmatpush1.bf16.msra.mxu1 %v1558_v30 }
 0x111   : > { %1123 = vmatpush1.bf16.msra.mxu0 %v1549_v31  ;;  %1169 = vmatprep.subr.bf16.mxu1 %v1566_v35 }
 0x112   : > { %1124 = vmatprep.subr.bf16.mxu0 %v1557_v32 }
 0x114   : > { %1170 = vmatpush1.bf16.msra.mxu1 %v1564_v37 }
 0x115   : > { %1125 = vmatpush1.bf16.msra.mxu0 %v1555_v33  ;;  %1171 = vmatprep.subr.bf16.mxu1 %v1572_v39 }
 0x116   : > { %1126 = vmatprep.subr.bf16.mxu0 %v1563_v34 }
 0x118   : > { %1172 = vmatpush1.bf16.msra.mxu1 %v1570_v41 }
 0x119   : > { %1127 = vmatpush1.bf16.msra.mxu0 %v1561_v36  ;;  %1173 = vmatprep.subr.bf16.mxu1 %v1578_v43 }
 0x11a   : > { %1128 = vmatprep.subr.bf16.mxu0 %v1569_v38 }
 0x11c   : > { %1174 = vmatpush1.bf16.msra.mxu1 %v1576_v45 }
 0x11d   : > { %1129 = vmatpush1.bf16.msra.mxu0 %v1567_v40  ;;  %1175 = vmatprep.subr.bf16.mxu1 %v1584_v47 }
 0x11e   : > { %1130 = vmatprep.subr.bf16.mxu0 %v1575_v42 }
 0x120   : > { %1176 = vmatpush1.bf16.msra.mxu1 %v1582_v49 }
 0x121   : > { %1131 = vmatpush1.bf16.msra.mxu0 %v1573_v44  ;;  %1177 = vmatprep.subr.bf16.mxu1 %v1590_v51 }
 0x122   : > { %1132 = vmatprep.subr.bf16.mxu0 %v1581_v46 }
 0x124   : > { %1178 = vmatpush1.bf16.msra.mxu1 %v1588_v53 }
 0x125   : > { %1133 = vmatpush1.bf16.msra.mxu0 %v1579_v48 }
 0x126   : > { %1134 = vmatprep.subr.bf16.mxu0 %v1587_v50 }
 0x129   : > { %1135 = vmatpush1.bf16.msra.mxu0 %v1585_v52 }
 0x1c7   : > { %v896_v55 = vpop.f32.mrf.mxu1 }
 0x1c9   : > { %v1477_v56 = vpop.f32.mrf.mxu1 }
 0x1cb   : > { %v899_v57 = vpop.f32.mrf.mxu1 }
 0x1cc   : > { %v1424_v58 = vpop.f32.mrf.mxu0 }
 0x1cd   : > { %v1478_v59 = vpop.f32.mrf.mxu1 }
 0x1ce   : > { %v1425_v61 = vpop.f32.mrf.mxu0 }
 0x1cf   : > { %v1426_v62 = vadd.f32 %v1425_v61, %v1424_v58 }
 0x1d0   : > { %v1427_v63 = vpop.f32.mrf.mxu0 }
 0x1d1   : > { %v856_v0 = vadd.f32 %v1426_v62, %v1317_v60 }
 0x1d2   : > { %v1428_v1 = vpop.f32.mrf.mxu0 }
 0x1d3   : > { %v1429_v2 = vadd.f32 %v1428_v1, %v1427_v63  ;;  %v897_v3 = vadd.f32 %v896_v55, %v856_v0 }
 0x1d5   : > { %v859_v4 = vadd.f32 %v1429_v2, %v1317_v60  ;;  %v903_v6 = vmax.f32 %v897_v3, 0.0 }
 0x1d7   : > { %v900_v5 = vadd.f32 %v899_v57, %v859_v4 }
 0x1d9   : > { %v904_v7 = vmax.f32 %v900_v5, 0.0 }
 0x1db   : > { %v905_v8 = vpack.c.bf16 %v904_v7, %v903_v6 }
 0x1dd   : > { %1153 = vmatmul.mubr.bf16.vlgmr.msra.gmra.mxu0 %v905_v8  ;;  %1196 = vmatmul.mubr.bf16.vlgmr.msra.gmra.mxu1 %v905_v8 }
 0x29d   : > { %v1154_v20 = vpop.f32.mrf.mxu0  ;;  %v1197_v21 = vpop.f32.mrf.mxu1 }
 0x29e   : > { %v1155_v22 = vadd.f32 %v1154_v20, %v943_v16  ;;  %v1198_v23 = vadd.f32 %v1197_v21, %v951_v17 }
 0x29f   : > { %v1156_v24 = vpop.f32.mrf.mxu0  ;;  %v1199_v25 = vpop.f32.mrf.mxu1 }
 0x2a0   : > { %v1206_v26 = vmax.f32 %v1155_v22, 0.0  ;;  %v1208_v27 = vmax.f32 %v1198_v23, 0.0  ;;  %v1157_v28 = vadd.f32 %v1156_v24, %v947_v18  ;;  %v1200_v29 = vadd.f32 %v1199_v25, %v955_v19 }
 0x2a1   : > { %v1158_v30 = vpop.f32.mrf.mxu0  ;;  %v1201_v31 = vpop.f32.mrf.mxu1 }
 0x2a2   : > { %1214 = vst [vmem:[%s280_s9] sm:$0xff] %v1206_v26  ;;  %1216 = vst [vmem:[%s280_s9 + $0x10] sm:$0xff] %v1208_v27  ;;  %v1207_v32 = vmax.f32 %v1157_v28, 0.0  ;;  %v1209_v33 = vmax.f32 %v1200_v29, 0.0  ;;  %v1159_v34 = vadd.f32 %v1158_v30, %v943_v16  ;;  %v1202_v35 = vadd.f32 %v1201_v31, %v951_v17 }
 0x2a3   : > { %v1160_v36 = vpop.f32.mrf.mxu0  ;;  %v1203_v37 = vpop.f32.mrf.mxu1 }
 0x2a4   : > { %1215 = vst [vmem:[%s280_s9 + $0x8] sm:$0xff] %v1207_v32  ;;  %1217 = vst [vmem:[%s280_s9 + $0x18] sm:$0xff] %v1209_v33  ;;  %v1210_v38 = vmax.f32 %v1159_v34, 0.0  ;;  %v1212_v39 = vmax.f32 %v1202_v35, 0.0  ;;  %v1161_v40 = vadd.f32 %v1160_v36, %v947_v18  ;;  %v1204_v41 = vadd.f32 %v1203_v37, %v955_v19 }
 0x2a6   : > { %1218 = vst [vmem:[%s280_s9 + $0x20] sm:$0xff] %v1210_v38  ;;  %1220 = vst [vmem:[%s280_s9 + $0x30] sm:$0xff] %v1212_v39  ;;  %v1211_v42 = vmax.f32 %v1161_v40, 0.0  ;;  %v1213_v43 = vmax.f32 %v1204_v41, 0.0 }
 0x2a8   : > { %1219 = vst [vmem:[%s280_s9 + $0x28] sm:$0xff] %v1211_v42  ;;  %1221 = vst [vmem:[%s280_s9 + $0x38] sm:$0xff] %v1213_v43 }
 0x2a9 PF: > { %s17_s24 = sadd.s32 1, %s1597_s24  }
 0x2aa   : > { %p14_p5 = scmp.ge.s32.totalorder %s17_s24, 4  }
 0x2ac   :  { %16 = sbr.rel (!%p14_p5) target bundleno = 1 (0x1), region = 78 }

</bundles_post_ra>
